<compile_context>
chip_gen: v6e
topology: v6e:2x2x1
jax: 0.10.0
libtpu: 0.0.40
codegen_flags: <defaults>
</compile_context>

<pallas_src>
import functools

import jax
import jax.numpy as jnp
from jax.experimental import pallas as pl
from jax.experimental.pallas import tpu as pltpu


def _round_up(x, m):
    return ((x + m - 1) // m) * m


def _vmem_capacity_bytes():
    """Per-chip VMEM capacity; conservative v7x fallback if the query is unavailable."""
    try:
        return int(pltpu.get_tpu_info().vmem_capacity_bytes)
    except Exception:
        return 64 << 20


def _fused_mlp_kernel(num_layers, x_ref, *refs):
    """Whole MLP stack on one (tm, K) activation tile.

    refs = (w_0, b_0, w_1, b_1, ..., w_{L-1}, b_{L-1}, o_ref).
    Weights/biases are full-extent VMEM-resident blocks; intermediates never touch HBM.
    """
    o_ref = refs[-1]
    h = x_ref[...]
    for li in range(num_layers):
        w = refs[2 * li][...]
        b = refs[2 * li + 1][...]
        if h.dtype != w.dtype:          # bf16-streaming path: bf16 operands, f32 accumulation
            h = h.astype(w.dtype)
        h = jnp.dot(h, w, preferred_element_type=jnp.float32) + b.astype(jnp.float32)
        h = jnp.maximum(h, 0.0)
    o_ref[...] = h.astype(o_ref.dtype)


def dnn_forward(x, params, *, tm_pref=1024):
    """Forward pass of DNN (Linear -> ReLU -> Dropout[identity]) as one fused Pallas kernel.

    x:      (M, inputs_dim)
    params: list of (W, b) prepared by `prepare_params` — W is (in_features, out_features),
            b is (1, out_features); dtype f32 or bf16.
    """
    M, K = x.shape
    num_layers = len(params)
    dims = [K] + [w.shape[1] for (w, _) in params]
    n_out = dims[-1]
    itemsize = x.dtype.itemsize

    # ---- batch tile selection: no batch padding, ragged last tile is clipped by Mosaic ----
    tm = min(tm_pref, _round_up(M, 8))
    # v7x has 2 TensorCores: once the batch is big enough, keep >= 2 grid steps on the
    # "parallel" axis so both cores get work (no-op on 1-TC v5e/v6e).
    if M > 256 and pl.cdiv(M, tm) < 2:
        tm = max(256, _round_up(pl.cdiv(M, 2), 8))
    grid = (pl.cdiv(M, tm),)

    # ---- operands & BlockSpecs: everything at true shapes (full-extent last dims) ----
    ops = [x]
    in_specs = [pl.BlockSpec((tm, K), lambda i: (i, 0))]
    for (w, b) in params:
        kin, nout = w.shape
        ops += [w, b]
        in_specs += [
            pl.BlockSpec((kin, nout), lambda i: (0, 0)),  # weight: VMEM-resident, full extent
            pl.BlockSpec((1, nout), lambda i: (0, 0)),    # bias:   VMEM-resident, full extent
        ]

    # ---- VMEM budget (counts the default 2x double-buffering of every BlockSpec operand) ----
    wb_bytes = sum(int(w.size) * w.dtype.itemsize + int(b.size) * b.dtype.itemsize
                   for (w, b) in params)
    io_bytes = 2 * (tm * K + tm * n_out) * itemsize       # streamed x / out tiles, 2 buffers each
    act_bytes = 2 * tm * max(dims) * 4                     # f32 intermediate activations
    vmem_need = 2 * wb_bytes + io_bytes + act_bytes
    vmem_cap = int(0.85 * _vmem_capacity_bytes())
    assert vmem_need < vmem_cap, (
        "fused-MLP kernel assumes all weights + one activation tile fit in VMEM "
        f"(need {vmem_need} bytes, cap {vmem_cap} bytes)")
    vmem_limit = int(min(max(vmem_need + (4 << 20), 16 << 20), vmem_cap))

    # ---- scheduling hint from true (unpadded) shapes ----
    flops = 2 * M * sum(dims[i] * dims[i + 1] for i in range(num_layers))
    bytes_accessed = int(x.size) * itemsize + wb_bytes + M * n_out * itemsize
    cost = pl.CostEstimate(flops=flops, transcendentals=0, bytes_accessed=bytes_accessed)

    return pl.pallas_call(
        functools.partial(_fused_mlp_kernel, num_layers),
        out_shape=jax.ShapeDtypeStruct((M, n_out), x.dtype),
        grid_spec=pltpu.PrefetchScalarGridSpec(
            num_scalar_prefetch=0,
            grid=grid,
            in_specs=in_specs,
            out_specs=pl.BlockSpec((tm, n_out), lambda i: (i, 0)),
        ),
        compiler_params=pltpu.CompilerParams(
            dimension_semantics=("parallel",),
            vmem_limit_bytes=vmem_limit,
        ),
        cost_estimate=cost,
    )(*ops)


def init_dnn_params(key, inputs_dim, hidden_units):
    """Parameter init mirroring the PyTorch module:
    weights ~ xavier_normal_, biases ~ U(-1/sqrt(fan_in), 1/sqrt(fan_in)) (torch default)."""
    dims = [inputs_dim] + list(hidden_units)
    params = []
    for i in range(len(dims) - 1):
        fan_in, fan_out = dims[i], dims[i + 1]
        key, kw, kb = jax.random.split(key, 3)
        std = (2.0 / (fan_in + fan_out)) ** 0.5            # xavier normal, gain=1
        # stored as (in, out) — transpose of torch's (out, in)
        w = std * jax.random.normal(kw, (fan_in, fan_out), dtype=jnp.float32)
        bound = 1.0 / (fan_in ** 0.5)
        b = jax.random.uniform(kb, (fan_out,), dtype=jnp.float32,
                               minval=-bound, maxval=bound)
        params.append((w, b))
    return params


def prepare_params(params, dtype=jnp.float32):
    """One-time, outside the per-call forward: reshape biases to (1, N) and optionally cast
    weights/biases to bf16 for halved HBM streaming (f32 accumulation stays in-kernel)."""
    return [(jnp.asarray(w, dtype=dtype), jnp.asarray(b, dtype=dtype).reshape(1, -1))
            for (w, b) in params]


def _reference_forward(x, params):
    h = x
    for (w, b) in params:
        h = jnp.maximum(h @ w + b, 0.0)
    return h


if __name__ == "__main__":
    key = jax.random.PRNGKey(0)

    inputs_dim = 32
    hidden_units = (64, 32, 16)
    dropout_rate = 0.5  # nn.Dropout is identity at inference — no-op here

    kp, kx1, kx2, kx3 = jax.random.split(key, 4)
    raw_params = init_dnn_params(kp, inputs_dim, hidden_units)
    params_f32 = prepare_params(raw_params, jnp.float32)
    fwd = jax.jit(dnn_forward)

    # Small batch: single (partial) tile.
    x1 = jax.random.normal(kx1, (8, inputs_dim), dtype=jnp.float32)
    o1 = jax.block_until_ready(fwd(x1, params_f32))
    r1 = _reference_forward(x1, raw_params)
    assert o1.shape == (8, hidden_units[-1]), o1.shape
    assert jnp.allclose(o1, r1, atol=1e-5, rtol=1e-5), "mismatch vs JAX reference (batch=8)"

    # Non-divisible batch: 2-step "parallel" grid with a ragged (clipped) last tile.
    x2 = jax.random.normal(kx2, (300, inputs_dim), dtype=jnp.float32)
    o2 = jax.block_until_ready(fwd(x2, params_f32))
    r2 = _reference_forward(x2, raw_params)
    assert o2.shape == (300, hidden_units[-1]), o2.shape
    assert jnp.allclose(o2, r2, atol=1e-5, rtol=1e-5), "mismatch vs JAX reference (batch=300)"

    # Larger batch: exercises tm=1024 tiles across multiple grid steps.
    x3 = jax.random.normal(kx3, (2048, inputs_dim), dtype=jnp.float32)
    o3 = jax.block_until_ready(fwd(x3, params_f32))
    r3 = _reference_forward(x3, raw_params)
    assert o3.shape == (2048, hidden_units[-1]), o3.shape
    assert jnp.allclose(o3, r3, atol=1e-5, rtol=1e-5), "mismatch vs JAX reference (batch=2048)"

    # Optional bf16-streaming path (half HBM traffic, f32 accumulation) — loose tolerance check.
    params_bf16 = prepare_params(raw_params, jnp.bfloat16)
    o_bf = jax.block_until_ready(fwd(x2.astype(jnp.bfloat16), params_bf16))
    assert o_bf.shape == (300, hidden_units[-1]), o_bf.shape
    assert jnp.allclose(o_bf.astype(jnp.float32), r2, atol=0.1, rtol=0.1), "bf16 path mismatch"

    print("KERNEL_OK")
</pallas_src>

<mosaic_0001>
module attributes {stable_mosaic.version = 11 : i64} {
  func.func @_fused_mlp_kernel(%arg0: i32, %arg1: memref<8x32xf32, #tpu.memory_space<vmem>>, %arg2: memref<32x64xf32, #tpu.memory_space<vmem>>, %arg3: memref<1x64xf32, #tpu.memory_space<vmem>>, %arg4: memref<64x32xf32, #tpu.memory_space<vmem>>, %arg5: memref<1x32xf32, #tpu.memory_space<vmem>>, %arg6: memref<32x16xf32, #tpu.memory_space<vmem>>, %arg7: memref<1x16xf32, #tpu.memory_space<vmem>>, %arg8: memref<8x16xf32, #tpu.memory_space<vmem>>) attributes {dimension_semantics = [#tpu.dimension_semantics<parallel>], iteration_bounds = array<i64: 1>, scalar_prefetch = 0 : i64, scratch_operands = 0 : i64, tpu.core_type = #tpu.core_type<tc>, window_params = [{transform_indices = @transform_0, window_bounds = array<i64: 8, 32>}, {pipeline_mode = #tpu.pipeline_mode<synchronous>, transform_indices = @transform_1, window_bounds = array<i64: 32, 64>}, {pipeline_mode = #tpu.pipeline_mode<synchronous>, transform_indices = @transform_2, window_bounds = array<i64: 1, 64>}, {pipeline_mode = #tpu.pipeline_mode<synchronous>, transform_indices = @transform_3, window_bounds = array<i64: 64, 32>}, {pipeline_mode = #tpu.pipeline_mode<synchronous>, transform_indices = @transform_4, window_bounds = array<i64: 1, 32>}, {pipeline_mode = #tpu.pipeline_mode<synchronous>, transform_indices = @transform_5, window_bounds = array<i64: 32, 16>}, {pipeline_mode = #tpu.pipeline_mode<synchronous>, transform_indices = @transform_6, window_bounds = array<i64: 1, 16>}, {transform_indices = @transform_7, window_bounds = array<i64: 8, 16>}]} {
    %c0 = arith.constant 0 : index
    %c0_0 = arith.constant 0 : index
    %0 = vector.load %arg1[%c0, %c0_0] : memref<8x32xf32, #tpu.memory_space<vmem>>, vector<8x32xf32>
    %c0_1 = arith.constant 0 : index
    %c0_2 = arith.constant 0 : index
    %1 = vector.load %arg2[%c0_1, %c0_2] : memref<32x64xf32, #tpu.memory_space<vmem>>, vector<32x64xf32>
    %c0_3 = arith.constant 0 : index
    %c0_4 = arith.constant 0 : index
    %2 = vector.load %arg3[%c0_3, %c0_4] : memref<1x64xf32, #tpu.memory_space<vmem>>, vector<1x64xf32>
    %cst = arith.constant dense<0.000000e+00> : vector<8x64xf32>
    %3 = tpu.matmul %0, %1, %cst {dimension_numbers = #tpu.dot_dimension_numbers<[1], [0], [0], [1], [0, 0, 1, 1], [], []>} : vector<8x32xf32>, vector<32x64xf32>, vector<8x64xf32> -> vector<8x64xf32>
    %4 = vector.broadcast %2 : vector<1x64xf32> to vector<8x64xf32>
    %5 = arith.addf %3, %4 : vector<8x64xf32>
    %cst_5 = arith.constant 0.000000e+00 : f32
    %6 = vector.broadcast %cst_5 : f32 to vector<8x64xf32>
    %7 = arith.maximumf %5, %6 : vector<8x64xf32>
    %c0_6 = arith.constant 0 : index
    %c0_7 = arith.constant 0 : index
    %8 = vector.load %arg4[%c0_6, %c0_7] : memref<64x32xf32, #tpu.memory_space<vmem>>, vector<64x32xf32>
    %c0_8 = arith.constant 0 : index
    %c0_9 = arith.constant 0 : index
    %9 = vector.load %arg5[%c0_8, %c0_9] : memref<1x32xf32, #tpu.memory_space<vmem>>, vector<1x32xf32>
    %cst_10 = arith.constant dense<0.000000e+00> : vector<8x32xf32>
    %10 = tpu.matmul %7, %8, %cst_10 {dimension_numbers = #tpu.dot_dimension_numbers<[1], [0], [0], [1], [0, 0, 1, 1], [], []>} : vector<8x64xf32>, vector<64x32xf32>, vector<8x32xf32> -> vector<8x32xf32>
    %11 = vector.broadcast %9 : vector<1x32xf32> to vector<8x32xf32>
    %12 = arith.addf %10, %11 : vector<8x32xf32>
    %cst_11 = arith.constant 0.000000e+00 : f32
    %13 = vector.broadcast %cst_11 : f32 to vector<8x32xf32>
    %14 = arith.maximumf %12, %13 : vector<8x32xf32>
    %c0_12 = arith.constant 0 : index
    %c0_13 = arith.constant 0 : index
    %15 = vector.load %arg6[%c0_12, %c0_13] : memref<32x16xf32, #tpu.memory_space<vmem>>, vector<32x16xf32>
    %c0_14 = arith.constant 0 : index
    %c0_15 = arith.constant 0 : index
    %16 = vector.load %arg7[%c0_14, %c0_15] : memref<1x16xf32, #tpu.memory_space<vmem>>, vector<1x16xf32>
    %cst_16 = arith.constant dense<0.000000e+00> : vector<8x16xf32>
    %17 = tpu.matmul %14, %15, %cst_16 {dimension_numbers = #tpu.dot_dimension_numbers<[1], [0], [0], [1], [0, 0, 1, 1], [], []>} : vector<8x32xf32>, vector<32x16xf32>, vector<8x16xf32> -> vector<8x16xf32>
    %18 = vector.broadcast %16 : vector<1x16xf32> to vector<8x16xf32>
    %19 = arith.addf %17, %18 : vector<8x16xf32>
    %cst_17 = arith.constant 0.000000e+00 : f32
    %20 = vector.broadcast %cst_17 : f32 to vector<8x16xf32>
    %21 = arith.maximumf %19, %20 : vector<8x16xf32>
    %c0_18 = arith.constant 0 : index
    %c0_19 = arith.constant 0 : index
    %22 = vector.load %arg8[%c0_18, %c0_19] : memref<8x16xf32, #tpu.memory_space<vmem>>, vector<8x16xf32>
    tpu.vector_store %arg8[%c0_18, %c0_19], %21 {strides = array<i32>} : memref<8x16xf32, #tpu.memory_space<vmem>>, vector<8x16xf32>,
    return
  }
  func.func @transform_0(%arg0: i32) -> (i32, i32) {
    %c0_i32 = arith.constant 0 : i32
    %c0_i32_0 = arith.constant 0 : i32
    return %arg0, %c0_i32 : i32, i32
  }
  func.func @transform_1(%arg0: i32) -> (i32, i32) {
    %c0_i32 = arith.constant 0 : i32
    %c0_i32_0 = arith.constant 0 : i32
    %c0_i32_1 = arith.constant 0 : i32
    return %c0_i32, %c0_i32_0 : i32, i32
  }
  func.func @transform_2(%arg0: i32) -> (i32, i32) {
    %c0_i32 = arith.constant 0 : i32
    %c0_i32_0 = arith.constant 0 : i32
    %c0_i32_1 = arith.constant 0 : i32
    return %c0_i32, %c0_i32_0 : i32, i32
  }
  func.func @transform_3(%arg0: i32) -> (i32, i32) {
    %c0_i32 = arith.constant 0 : i32
    %c0_i32_0 = arith.constant 0 : i32
    %c0_i32_1 = arith.constant 0 : i32
    return %c0_i32, %c0_i32_0 : i32, i32
  }
  func.func @transform_4(%arg0: i32) -> (i32, i32) {
    %c0_i32 = arith.constant 0 : i32
    %c0_i32_0 = arith.constant 0 : i32
    %c0_i32_1 = arith.constant 0 : i32
    return %c0_i32, %c0_i32_0 : i32, i32
  }
  func.func @transform_5(%arg0: i32) -> (i32, i32) {
    %c0_i32 = arith.constant 0 : i32
    %c0_i32_0 = arith.constant 0 : i32
    %c0_i32_1 = arith.constant 0 : i32
    return %c0_i32, %c0_i32_0 : i32, i32
  }
  func.func @transform_6(%arg0: i32) -> (i32, i32) {
    %c0_i32 = arith.constant 0 : i32
    %c0_i32_0 = arith.constant 0 : i32
    %c0_i32_1 = arith.constant 0 : i32
    return %c0_i32, %c0_i32_0 : i32, i32
  }
  func.func @transform_7(%arg0: i32) -> (i32, i32) {
    %c0_i32 = arith.constant 0 : i32
    %c0_i32_0 = arith.constant 0 : i32
    return %arg0, %c0_i32 : i32, i32
  }
}

</mosaic_0001>

<bundles_post_ra>
// kernel: dnn_forward.1
= control target key start
LH: loop header
LB: loop body
LE: loop exit
PB: predicated region body
PF: predicated region fallthrough
CT: control target
= control target key end

     0   :  { %v396_v1 = vmov 0.0   ;;  %vm397_vm0 = vmmov 0   ;;  %s507_s0 = inlined_call_operand.vmem [shape: f32[8,32], index: 0, kind: input, shape index: {}]   ;;  %s508_s1 = inlined_call_operand.vmem [shape: f32[32,64], index: 1, kind: input, shape index: {}]   ;;  %s509_s2 = inlined_call_operand.vmem [shape: f32[1,64], index: 2, kind: input, shape index: {}]   ;;  %s510_s3 = inlined_call_operand.vmem [shape: f32[64,32], index: 3, kind: input, shape index: {}]   ;;  %s511_s4 = inlined_call_operand.vmem [shape: f32[1,32], index: 4, kind: input, shape index: {}]   ;;  %s512_s5 = inlined_call_operand.vmem [shape: f32[32,16], index: 5, kind: input, shape index: {}]   ;;  %s513_s6 = inlined_call_operand.vmem [shape: f32[1,16], index: 6, kind: input, shape index: {}]   ;;  %s514_s7 = inlined_call_operand.hbm [shape: f32[8,16], index: 7, kind: output, shape index: {}]  }
   0x1   :  { %v31_v0 = vld [vmem:[%s508_s1 + $0x18] sm:$0xff]  ;;  %330 = vmatprep.subr.mxu0 %v396_v1  ;;  %v30_v2 = vld [vmem:[%s508_s1 + $0x10] sm:$0xff]  ;;  %338 = vmatprep.mubr.msk.f32.mxu0 %vm397_vm0, %v396_v1  ;;  %v29_v5 = vld [vmem:[%s508_s1 + $0x8] sm:$0xff] }
   0x2   :  { %v121_v3 = vld [vmem:[%s510_s3 + $0x38] sm:$0xff]  ;;  %331 = vmatpush3.msra.mxu0 %v31_v0  ;;  %341 = vmatprep.subr.mxu1 %v396_v1  ;;  %v120_v4 = vld [vmem:[%s510_s3 + $0x30] sm:$0xff] }
   0x3   :  { %332 = vmatprep.subr.mxu0 %v396_v1  ;;  %342 = vmatpush3.msra.mxu1 %v121_v3 }
   0x4   :  { %12 = vsyncpa [#allocation3], 0  ;;  %333 = vmatpush3.msra.mxu0 %v30_v2  ;;  %343 = vmatprep.subr.mxu1 %v396_v1  ;;  %v119_v6 = vld [vmem:[%s510_s3 + $0x28] sm:$0xff]  ;;  %v28_v7 = vld [vmem:[%s508_s1] sm:$0xff]  ;;  %vm39_vm1 = vcmask 261120   ;;  %vm129_vm2 = vcmask 523264  }
   0x5   :  { %334 = vmatprep.subr.mxu0 %v396_v1  ;;  %344 = vmatpush3.msra.mxu1 %v120_v4  ;;  %v27_v8 = vld [vmem:[%s507_s0] sm:$0xff]  ;;  %v117_v10 = vld [vmem:[%s510_s3 + $0x18] sm:$0xff]  ;;  %v116_v11 = vld [vmem:[%s510_s3 + $0x10] sm:$0xff]  ;;  %s398_s14 = smov [#allocation2]   ;;  %vm289_vm3 = vcmask 130048  }
   0x6   :  { %335 = vmatpush3.msra.mxu0 %v29_v5  ;;  %345 = vmatprep.subr.mxu1 %v396_v1  ;;  %v118_v9 = vld [vmem:[%s510_s3 + $0x20] sm:$0xff]  ;;  %v115_v12 = vld [vmem:[%s510_s3 + $0x8] sm:$0xff]  ;;  %v207_v14 = vld [vmem:[%s512_s5 + $0x18] sm:$0xff]  ;;  %s297_s15 = sshll.u32 %s398_s14, 4  ;;  %s298_s15 = int_to_ptr.vmem [resolvable:$true] %s297_s15 }
   0x7   :  { %336 = vmatprep.subr.mxu0 %v396_v1  ;;  %346 = vmatpush3.msra.mxu1 %v119_v6  ;;  %v114_v13 = vld [vmem:[%s510_s3] sm:$0xff]  ;;  %v206_v20 = vld [vmem:[%s512_s5 + $0x10] sm:$0xff]  ;;  %v205_v21 = vld [vmem:[%s512_s5 + $0x8] sm:$0xff]  ;;  %p379_p1 = scmp.lt.s32.totalorder %s298_s15, %s298_s15 }
   0x8   :  { %337 = vmatpush3.msra.mxu0 %v28_v7  ;;  %347 = vmatprep.subr.mxu1 %v396_v1  ;;  %v305_v15 = vld [vmem:[%s509_s2] ss:$0 sm:$0xff] }
   0x9   :  { %339 = vmatmul.mubr.msk.f32.vlgmr.msra.gmra.mxu0 %vm39_vm1, %v27_v8  ;;  %348 = vmatpush3.msra.mxu1 %v118_v9  ;;  %v204_v22 = vld [vmem:[%s512_s5] sm:$0xff] }
   0xa   :  { %349 = vmatprep.subr.mxu1 %v396_v1  ;;  %357 = vmatprep.mubr.msk.f32.mxu1 %vm397_vm0, %v396_v1  ;;  %v307_v23 = vld [vmem:[%s511_s4] ss:$0 sm:$0xff]  ;;  %s374_s4 = scalar_lea.vmem %s298_s15, 128 }
   0xb   :  { %350 = vmatpush3.msra.mxu1 %v117_v10  ;;  %360 = vmatprep.subr.mxu0 %v396_v1  ;;  %v309_v28 = vld [vmem:[%s513_s6] ss:$0 sm:$0xff]  ;;  %p375_p0 = scmp.ne.s32.totalorder %s298_s15, %s374_s4  ;;  %p380_p2 = scmp.lt.s32.totalorder %s374_s4, %s374_s4 }
   0xc   :  { %351 = vmatprep.subr.mxu1 %v396_v1  ;;  %368 = vmatprep.mubr.msk.f32.mxu0 %vm397_vm0, %v396_v1 }
   0xd   :  { %352 = vmatpush3.msra.mxu1 %v116_v11  ;;  %361 = vmatpush3.msra.mxu0 %v207_v14  ;;  %p381_p3 = por %p380_p2, %p379_p1 }
   0xe   :  { %353 = vmatprep.subr.mxu1 %v396_v1  ;;  %362 = vmatprep.subr.mxu0 %v396_v1 }
   0xf   :  { %354 = vmatpush3.msra.mxu1 %v115_v12  ;;  %363 = vmatpush3.msra.mxu0 %v206_v20  ;;  %p382_p4 = pnand %p381_p3, %p375_p0 }
  0x10   :  { %355 = vmatprep.subr.mxu1 %v396_v1  ;;  %364 = vmatprep.subr.mxu0 %v396_v1 }
  0x11   :  { %356 = vmatpush3.msra.mxu1 %v114_v13  ;;  %365 = vmatpush3.msra.mxu0 %v205_v21 }
  0x12   :  { %366 = vmatprep.subr.mxu0 %v396_v1 }
  0x13   :  { %367 = vmatpush3.msra.mxu0 %v204_v22 }
  0xc9   :  { %v109_v16 = vpop.f32.mrf.mxu0 }
  0xca   :  { %v110_v17 = vadd.f32 %v305_v15, %v109_v16 }
  0xcb   :  { %v340_v18 = vpop.f32.mrf.mxu0 }
  0xcc   :  { %v113_v19 = vmax.f32 %v110_v17, 0.0 }
  0xce   :  { %358 = vmatmul.mubr.msk.f32.vlgmr.msra.gmra.mxu1 %vm129_vm2, %v113_v19 }
 0x18e   :  { %v199_v24 = vpop.f32.mrf.mxu1 }
 0x18f   :  { %v200_v25 = vadd.f32 %v307_v23, %v199_v24 }
 0x190   :  { %v359_v26 = vpop.f32.mrf.mxu1 }
 0x191   :  { %v203_v27 = vmax.f32 %v200_v25, 0.0 }
 0x193   :  { %369 = vmatmul.mubr.msk.f32.vlgmr.msra.gmra.mxu0 %vm39_vm1, %v203_v27 }
 0x253   :  { %v284_v29 = vpop.f32.mrf.mxu0 }
 0x254   :  { %v285_v30 = vadd.f32 %v309_v28, %v284_v29 }
 0x255   :  { %v370_v31 = vpop.f32.mrf.mxu0 }
 0x256   :  { %v288_v32 = vmax.f32 %v285_v30, 0.0 }
 0x258   :  { %290 = vst.msk [vmem:[#allocation2] sm:$0xff] %vm289_vm3, %v288_v32 }
 0x259   :  { %385 = shalt.err (!%p382_p4)
}
 0x25a   :  { %300 = dma.vmem_to_hbm [thread:$0]  %s298_s15, 128, %s514_s7, [#allocation3]  }
 0x25b   :  { %394 = dma.done.wait [#allocation3], 128  }
 0x25c   :  { %395 = vsyncadd [#allocation3], 4294967168 }
 0x25d   :  { %304 = vsyncpa [#allocation3], 1 }

</bundles_post_ra>
